<compile_context>
chip_gen: v7x
topology: tpu7x:2x2x1
jax: 0.10.0
libtpu: 0.0.40
codegen_flags: <defaults>
</compile_context>

<pallas_src>
import jax
import jax.numpy as jnp
from jax import lax
from jax.experimental import pallas as pl
from jax.experimental.pallas import tpu as pltpu


def _va_head_kernel(feat_ref, w_ref, b_ref, out_ref):
    """Fused pool+linear head as one MXU contraction per batch tile.

    feat_ref: (TN, C*H*W) native dtype  -- flattened NCHW feature maps.
    w_ref:    (2, C*H*W)                -- fused [valence; arousal] weights, pre-scaled
                                           by 1/HW and expanded over spatial positions.
    b_ref:    (1, 2) float32            -- fused biases.
    out_ref:  (TN, 2) float32.
    """
    out = lax.dot_general(
        feat_ref[...], w_ref[...],
        dimension_numbers=(((1,), (1,)), ((), ())),   # contract last dims (K = C*HW)
        preferred_element_type=jnp.float32,
    )
    out_ref[...] = out + b_ref[...]


def _choose_batch_tile(n, row_bytes, per_buffer_budget=12 * 1024 * 1024):
    """Batch tile sized for ~12 MiB per (double-buffered) input block.

    The block's sublane dim must be a multiple of 8 or equal to the full batch.  When
    the whole batch fits in one tile we still split into >=2 grid steps (when legal)
    so the "parallel" batch axis can use v7x's second TensorCore.
    """
    tn = per_buffer_budget // max(row_bytes, 1)
    if tn >= n:
        if n > 8:
            half = ((-(-n // 2)) + 7) // 8 * 8   # ceil(n/2) rounded up to multiple of 8
            if half < n:
                return half
        return n
    tn = max(8, (tn // 8) * 8)
    return min(tn, n)


def va_regression_forward(features_nchw, wv, bv, wa, ba):
    """features_nchw: (N, C, H, W) backbone feature maps (f32 or bf16).
    wv, wa: (1, C) PyTorch-style Linear weights; bv, ba: (1,) biases.
    Returns (valence, arousal), each (N, 1) float32."""
    N, C, H, W = features_nchw.shape
    HW = H * W
    CHW = C * HW

    # Free contiguous view of NCHW: element (n, c*HW + hw) == features[n, c, h, w].
    feat = features_nchw.reshape(N, CHW)

    # Fuse both heads and fold the average pool into the weights:
    #   out[n, o] = sum_{c,hw} feat[n, c*HW + hw] * (w[o, c] / HW) + b[o]
    w2 = jnp.concatenate([wv, wa], axis=0).astype(jnp.float32)        # (2, C)
    w_flat = jnp.repeat(w2 / HW, HW, axis=1)                          # (2, C*HW)
    if feat.dtype != jnp.float32:
        # Let the MXU consume native bf16 features directly (f32 accumulation in-kernel).
        w_flat = w_flat.astype(feat.dtype)
    b2 = jnp.concatenate([bv.reshape(1, 1), ba.reshape(1, 1)], axis=1).astype(jnp.float32)

    itemsize = feat.dtype.itemsize
    tn = _choose_batch_tile(N, CHW * itemsize)
    grid = (pl.cdiv(N, tn),)

    # Explicit VMEM budget: 2x double-buffered feature tiles + sublane-padded resident
    # weight + small outputs, clamped under v7x's 64 MiB physical VMEM.
    tile_bytes = tn * CHW * itemsize
    w_vmem = 8 * CHW * w_flat.dtype.itemsize
    need = 2 * tile_bytes + 2 * w_vmem + 2 * tn * 128 * 4 + (1 << 20)
    vmem_limit = int(min(max(need * 3 // 2, 32 << 20), 48 << 20))

    # Honest estimate: one pass over the features + tiny weights/outputs.
    cost = pl.CostEstimate(
        flops=2 * N * CHW * 2,
        transcendentals=0,
        bytes_accessed=N * CHW * itemsize
        + 2 * CHW * w_flat.dtype.itemsize
        + N * 2 * 4
        + 2 * 4,
    )

    out = pl.pallas_call(
        _va_head_kernel,
        out_shape=jax.ShapeDtypeStruct((N, 2), jnp.float32),
        grid=grid,
        in_specs=[
            pl.BlockSpec((tn, CHW), lambda i: (i, 0)),  # streamed feature tile
            pl.BlockSpec((2, CHW), lambda i: (0, 0)),   # fused pre-scaled weights (resident)
            pl.BlockSpec((1, 2), lambda i: (0, 0)),     # fused biases (resident)
        ],
        out_specs=pl.BlockSpec((tn, 2), lambda i: (i, 0)),
        compiler_params=pltpu.CompilerParams(
            dimension_semantics=("parallel",),
            vmem_limit_bytes=vmem_limit,
        ),
        cost_estimate=cost,
    )(feat, w_flat, b2)

    v = out[:, 0:1]
    a = out[:, 1:2]
    return v, a


def va_regression_reference(features_nchw, wv, bv, wa, ba):
    pooled = jnp.mean(features_nchw.astype(jnp.float32), axis=(2, 3))  # (N, C)
    v = pooled @ wv.T + bv                                             # (N, 1)
    a = pooled @ wa.T + ba                                             # (N, 1)
    return v, a


if __name__ == "__main__":
    key = jax.random.PRNGKey(0)
    k_feat, k_wv, k_bv, k_wa, k_ba = jax.random.split(key, 5)

    # Small, deterministic shapes: batch=2, num_feature_maps=32, spatial=8x8.
    N, C, H, W = 2, 32, 8, 8
    features = jax.random.normal(k_feat, (N, C, H, W), dtype=jnp.float32)

    # nn.Linear(num_feature_maps, 1) parameters (uniform init like PyTorch default scale).
    bound = 1.0 / jnp.sqrt(jnp.float32(C))
    wv = jax.random.uniform(k_wv, (1, C), jnp.float32, -bound, bound)
    bv = jax.random.uniform(k_bv, (1,), jnp.float32, -bound, bound)
    wa = jax.random.uniform(k_wa, (1, C), jnp.float32, -bound, bound)
    ba = jax.random.uniform(k_ba, (1,), jnp.float32, -bound, bound)

    v, a = va_regression_forward(features, wv, bv, wa, ba)
    jax.block_until_ready((v, a))

    v_ref, a_ref = va_regression_reference(features, wv, bv, wa, ba)
    assert v.shape == (N, 1) and a.shape == (N, 1)
    assert jnp.allclose(v, v_ref, atol=1e-4, rtol=1e-4)
    assert jnp.allclose(a, a_ref, atol=1e-4, rtol=1e-4)

    print("KERNEL_OK")
</pallas_src>

<mosaic_0001>
module attributes {stable_mosaic.version = 11 : i64} {
  func.func @_va_head_kernel(%arg0: i32, %arg1: memref<2x2048xf32, #tpu.memory_space<vmem>>, %arg2: memref<2x2048xf32, #tpu.memory_space<vmem>>, %arg3: memref<1x2xf32, #tpu.memory_space<vmem>>, %arg4: memref<2x2xf32, #tpu.memory_space<vmem>>) attributes {dimension_semantics = [#tpu.dimension_semantics<parallel>], iteration_bounds = array<i64: 1>, scalar_prefetch = 0 : i64, scratch_operands = 0 : i64, tpu.core_type = #tpu.core_type<tc>, window_params = [{transform_indices = @transform_0, window_bounds = array<i64: 2, 2048>}, {pipeline_mode = #tpu.pipeline_mode<synchronous>, transform_indices = @transform_1, window_bounds = array<i64: 2, 2048>}, {pipeline_mode = #tpu.pipeline_mode<synchronous>, transform_indices = @transform_2, window_bounds = array<i64: 1, 2>}, {transform_indices = @transform_3, window_bounds = array<i64: 2, 2>}]} {
    %c0 = arith.constant 0 : index
    %c0_0 = arith.constant 0 : index
    %0 = vector.load %arg1[%c0, %c0_0] : memref<2x2048xf32, #tpu.memory_space<vmem>>, vector<2x2048xf32>
    %c0_1 = arith.constant 0 : index
    %c0_2 = arith.constant 0 : index
    %1 = vector.load %arg2[%c0_1, %c0_2] : memref<2x2048xf32, #tpu.memory_space<vmem>>, vector<2x2048xf32>
    %cst = arith.constant dense<0.000000e+00> : vector<2x2xf32>
    %2 = tpu.matmul %0, %1, %cst {dimension_numbers = #tpu.dot_dimension_numbers<[1], [1], [0], [0], [0, 0, 1, 0], [], []>} : vector<2x2048xf32>, vector<2x2048xf32>, vector<2x2xf32> -> vector<2x2xf32>
    %c0_3 = arith.constant 0 : index
    %c0_4 = arith.constant 0 : index
    %3 = vector.load %arg3[%c0_3, %c0_4] : memref<1x2xf32, #tpu.memory_space<vmem>>, vector<1x2xf32>
    %4 = vector.broadcast %3 : vector<1x2xf32> to vector<2x2xf32>
    %5 = arith.addf %2, %4 : vector<2x2xf32>
    %c0_5 = arith.constant 0 : index
    %c0_6 = arith.constant 0 : index
    %6 = vector.load %arg4[%c0_5, %c0_6] : memref<2x2xf32, #tpu.memory_space<vmem>>, vector<2x2xf32>
    tpu.vector_store %arg4[%c0_5, %c0_6], %5 {strides = array<i32>} : memref<2x2xf32, #tpu.memory_space<vmem>>, vector<2x2xf32>,
    return
  }
  func.func @transform_0(%arg0: i32) -> (i32, i32) {
    %c0_i32 = arith.constant 0 : i32
    %c0_i32_0 = arith.constant 0 : i32
    return %arg0, %c0_i32 : i32, i32
  }
  func.func @transform_1(%arg0: i32) -> (i32, i32) {
    %c0_i32 = arith.constant 0 : i32
    %c0_i32_0 = arith.constant 0 : i32
    %c0_i32_1 = arith.constant 0 : i32
    return %c0_i32, %c0_i32_0 : i32, i32
  }
  func.func @transform_2(%arg0: i32) -> (i32, i32) {
    %c0_i32 = arith.constant 0 : i32
    %c0_i32_0 = arith.constant 0 : i32
    %c0_i32_1 = arith.constant 0 : i32
    return %c0_i32, %c0_i32_0 : i32, i32
  }
  func.func @transform_3(%arg0: i32) -> (i32, i32) {
    %c0_i32 = arith.constant 0 : i32
    %c0_i32_0 = arith.constant 0 : i32
    return %arg0, %c0_i32 : i32, i32
  }
}

</mosaic_0001>

<bundles_post_ra>
// kernel: tpu_custom_call.1
= control target key start
LH: loop header
LB: loop body
LE: loop exit
PB: predicated region body
PF: predicated region fallthrough
CT: control target
= control target key end

     0   :  { %8 = vsyncpa [#allocation3], 0  ;;  %s988_s0 = inlined_call_operand.hbm [shape: f32[2,2048], index: 0, kind: input, shape index: {}]   ;;  %s989_s1 = inlined_call_operand.hbm [shape: f32[2,2048], index: 1, kind: input, shape index: {}]   ;;  %s990_s2 = inlined_call_operand.vmem [shape: f32[1,2], index: 2, kind: input, shape index: {}]   ;;  %s991_s3 = inlined_call_operand.hbm [shape: f32[2,2], index: 3, kind: output, shape index: {}]  }
   0x1   :  { %9 = vsyncpa [#allocation6], 0 }
   0x2   :  { %10 = vsyncpa [#allocation4], 0  ;;  %s907_s12 = smov [#allocation2]   ;;  %s908_s14 = smov [#allocation5]  }
   0x3   :  { %s17_s13 = sshll.u32 %s907_s12, 4  ;;  %s27_s15 = sshll.u32 %s908_s14, 4  ;;  %s18_s13 = int_to_ptr.vmem [resolvable:$true] %s17_s13  ;;  %s28_s15 = int_to_ptr.vmem [resolvable:$true] %s27_s15 }
   0x4   :  { %s835_s18 = scalar_lea.hbm %s988_s0, 512 }
   0x5   :  { %p836_p0 = scmp.ne.s32.totalorder %s988_s0, %s835_s18  ;;  %p839_p1 = scmp.lt.u32.totalorder %s835_s18, %s988_s0 }
   0x7   :  { %p841_p2 = pnand %p839_p1, %p836_p0 }
   0x9   :  { %844 = shalt.err (!%p841_p2)
}
   0xa   :  { %s845_s23 = scalar_lea.vmem %s18_s13, 512  ;;  %p850_p4 = scmp.lt.s32.totalorder %s18_s13, %s18_s13 }
   0xb   :  { %p846_p3 = scmp.ne.s32.totalorder %s18_s13, %s845_s23  ;;  %p851_p5 = scmp.lt.s32.totalorder %s845_s23, %s845_s23 }
   0xd   :  { %p852_p6 = por %p851_p5, %p850_p4 }
   0xf   :  { %p853_p7 = pnand %p852_p6, %p846_p3 }
  0x11   :  { %856 = shalt.err (!%p853_p7)
}
  0x12   :  { %20 = dma.hbm_to_vmem [thread:$0]  %s988_s0, 512, %s18_s13, [#allocation3]  }
  0x13   :  { %s857_s28 = scalar_lea.hbm %s989_s1, 512 }
  0x14   :  { %p858_p8 = scmp.ne.s32.totalorder %s989_s1, %s857_s28  ;;  %p861_p9 = scmp.lt.u32.totalorder %s857_s28, %s989_s1 }
  0x16   :  { %p863_p10 = pnand %p861_p9, %p858_p8 }
  0x18   :  { %866 = shalt.err (!%p863_p10)
}
  0x19   :  { %s867_s6 = scalar_lea.vmem %s28_s15, 512  ;;  %p872_p12 = scmp.lt.s32.totalorder %s28_s15, %s28_s15 }
  0x1a   :  { %p868_p11 = scmp.ne.s32.totalorder %s28_s15, %s867_s6  ;;  %p873_p13 = scmp.lt.s32.totalorder %s867_s6, %s867_s6 }
  0x1c   :  { %p874_p0 = por %p873_p13, %p872_p12 }
  0x1e   :  { %p875_p1 = pnand %p874_p0, %p868_p11 }
  0x20   :  { %878 = shalt.err (!%p875_p1)
}
  0x21   :  { %30 = dma.hbm_to_vmem [thread:$0]  %s989_s1, 512, %s28_s15, [#allocation6]  }
  0x22   :  { %901 = dma.done.wait [#allocation3], 512  }
  0x23   :  { %902 = vsyncadd [#allocation3], 4294966784 }
  0x24   :  { %903 = dma.done.wait [#allocation6], 512  }
  0x25   :  { %904 = vsyncadd [#allocation6], 4294966784  ;;  %v62_v0 = vlaneseq  ;;  %v909_v1 = vmov 1983009808   ;;  %v43_v6 = vld [vmem:[#allocation5] sm:$0xff]  ;;  %v45_v7 = vld [vmem:[#allocation5 + $0x10] sm:$0xff] }
  0x26   :  { %v60_v2 = vunpack.c.l.s4 %v909_v1  ;;  %v39_v8 = vld [vmem:[#allocation2] sm:$0xff]  ;;  %v146_v9 = vcombine.high %v43_v6, %v43_v6  ;;  %v180_v11 = vcombine.high %v45_v7, %v45_v7  ;;  %v41_v13 = vld [vmem:[#allocation2 + $0x10] sm:$0xff]  ;;  %v44_v18 = vld [vmem:[#allocation5 + $0x8] sm:$0xff]  ;;  %s910_s9 = smov [#allocation7]   ;;  %vm790_vm0 = vcmask 9216  }
  0x27   :  { %v63_v3 = vshrl.u32 %v62_v0, 7  ;;  %v58_v14 = vcombine.high %v39_v8, %v39_v8  ;;  %v92_v16 = vcombine.high %v41_v13, %v41_v13  ;;  %v46_v23 = vld [vmem:[#allocation5 + $0x18] sm:$0xff]  ;;  %v40_v36 = vld [vmem:[#allocation2 + $0x8] sm:$0xff]  ;;  %v163_v38 = vcombine.high %v44_v18, %v44_v18  ;;  %v808_v54 = vld [vmem:[%s990_s2] ss:$0 sm:$0xff]  ;;  %s798_s10 = sshll.u32 %s910_s9, 4  ;;  %s799_s10 = int_to_ptr.vmem [resolvable:$true] %s798_s10 }
  0x28   :  { %v61_v4 = vunpack.c.0.s8 %v60_v2  ;;  %v42_v37 = vld [vmem:[#allocation2 + $0x18] sm:$0xff]  ;;  %v197_v39 = vcombine.high %v46_v23, %v46_v23  ;;  %v75_v46 = vcombine.high %v40_v36, %v40_v36  ;;  %s879_s11 = scalar_lea.vmem %s799_s10, 32  ;;  %p884_p3 = scmp.lt.s32.totalorder %s799_s10, %s799_s10 }
  0x29   :  { %v109_v47 = vcombine.high %v42_v37, %v42_v37  ;;  %p880_p2 = scmp.ne.s32.totalorder %s799_s10, %s879_s11  ;;  %p885_p4 = scmp.lt.s32.totalorder %s879_s11, %s879_s11 }
  0x2a   :  { %v955_v5 = vsub.s32 %v61_v4, %v63_v3 }
  0x2b   :  { %p886_p5 = por %p885_p4, %p884_p3 }
  0x2c   :  { %v153_v10 = vrot.slane %v43_v6, %v955_v5  ;;  %v187_v12 = vrot.slane %v45_v7, %v955_v5  ;;  %v65_v15 = vrot.slane %v39_v8, %v955_v5  ;;  %v99_v17 = vrot.slane %v41_v13, %v955_v5 }
  0x2d   :  { %v160_v21 = vrot.slane %v146_v9, %v955_v5  ;;  %v194_v22 = vrot.slane %v180_v11, %v955_v5  ;;  %v72_v26 = vrot.slane %v58_v14, %v955_v5  ;;  %v106_v27 = vrot.slane %v92_v16, %v955_v5  ;;  %p887_p6 = pnand %p886_p5, %p880_p2 }
  0x2e   :  { %v161_v19 = vcombine.high %v153_v10, %v153_v10  ;;  %v195_v20 = vcombine.high %v187_v12, %v187_v12  ;;  %v73_v24 = vcombine.high %v65_v15, %v65_v15  ;;  %v107_v25 = vcombine.high %v99_v17, %v99_v17 }
  0x2f   :  { %v162_v28 = vcombine.high %v160_v21, %v160_v21  ;;  %v196_v29 = vcombine.high %v194_v22, %v194_v22  ;;  %v170_v30 = vrot.slane %v44_v18, %v955_v5  ;;  %v204_v31 = vrot.slane %v46_v23, %v955_v5 }
  0x30   :  { %230 = vmatprep.subr.mxu1 %v161_v19  ;;  %510 = vmatprep.subr.mxu0 %v195_v20  ;;  %v74_v32 = vcombine.high %v72_v26, %v72_v26  ;;  %v108_v33 = vcombine.high %v106_v27, %v106_v27  ;;  %v82_v40 = vrot.slane %v40_v36, %v955_v5 }
  0x31   :  { %231 = vmatpush1.xpose.msra.mxu1 %v153_v10  ;;  %511 = vmatpush1.xpose.msra.mxu0 %v187_v12  ;;  %v178_v34 = vcombine.high %v170_v30, %v170_v30  ;;  %v212_v35 = vcombine.high %v204_v31, %v204_v31  ;;  %v116_v41 = vrot.slane %v42_v37, %v955_v5 }
  0x32   :  { %294 = vmatprep.mubr.f32.mxu1 %v73_v24  ;;  %574 = vmatprep.mubr.f32.mxu0 %v107_v25  ;;  %v177_v42 = vrot.slane %v163_v38, %v955_v5  ;;  %v211_v43 = vrot.slane %v197_v39, %v955_v5  ;;  %v90_v44 = vcombine.high %v82_v40, %v82_v40 }
  0x33   :  { %300 = vmatprep.subr.mxu1 %v162_v28  ;;  %580 = vmatprep.subr.mxu0 %v196_v29  ;;  %v124_v45 = vcombine.high %v116_v41, %v116_v41  ;;  %v89_v50 = vrot.slane %v75_v46, %v955_v5  ;;  %v123_v51 = vrot.slane %v109_v47, %v955_v5 }
  0x34   :  { %295 = vmatmul.mubr.f32.vlgmr.msra.gmra.mrb[0].mxu1 %v65_v15  ;;  %575 = vmatmul.mubr.f32.vlgmr.msra.gmra.mrb[0].mxu0 %v99_v17  ;;  %v179_v48 = vcombine.high %v177_v42, %v177_v42  ;;  %v213_v49 = vcombine.high %v211_v43, %v211_v43 }
  0x35   :  { %301 = vmatpush1.xpose.msra.mxu1 %v160_v21  ;;  %581 = vmatpush1.xpose.msra.mxu0 %v194_v22  ;;  %v91_v52 = vcombine.high %v89_v50, %v89_v50  ;;  %v125_v53 = vcombine.high %v123_v51, %v123_v51 }
  0x36   :  { %364 = vmatprep.mubr.f32.mxu1 %v74_v32  ;;  %644 = vmatprep.mubr.f32.mxu0 %v108_v33 }
  0x37   :  { %370 = vmatprep.subr.mxu1 %v178_v34  ;;  %650 = vmatprep.subr.mxu0 %v212_v35 }
  0x3c   :  { %365 = vmatmul.mubr.f32.vlgmr.msra.gmra.mrb[0].mxu1 %v72_v26  ;;  %645 = vmatmul.mubr.f32.vlgmr.msra.gmra.mrb[0].mxu0 %v106_v27 }
  0x3d   :  { %371 = vmatpush1.xpose.msra.mxu1 %v170_v30  ;;  %651 = vmatpush1.xpose.msra.mxu0 %v204_v31 }
  0x3e   :  { %434 = vmatprep.mubr.f32.mxu1 %v90_v44  ;;  %714 = vmatprep.mubr.f32.mxu0 %v124_v45 }
  0x3f   :  { %440 = vmatprep.subr.mxu1 %v179_v48  ;;  %720 = vmatprep.subr.mxu0 %v213_v49 }
  0x44   :  { %435 = vmatmul.mubr.f32.vlgmr.msra.gmra.mrb[0].mxu1 %v82_v40  ;;  %715 = vmatmul.mubr.f32.vlgmr.msra.gmra.mrb[0].mxu0 %v116_v41 }
  0x45   :  { %441 = vmatpush1.xpose.msra.mxu1 %v177_v42  ;;  %721 = vmatpush1.xpose.msra.mxu0 %v211_v43 }
  0x46   :  { %504 = vmatprep.mubr.f32.mxu1 %v91_v52  ;;  %784 = vmatprep.mubr.f32.mxu0 %v125_v53 }
  0x4c   :  { %505 = vmatmul.mubr.f32.vlgmr.msra.gmra.mrb[0].mxu1 %v89_v50  ;;  %785 = vmatmul.mubr.f32.vlgmr.msra.gmra.mrb[0].mxu0 %v123_v51 }
 0x11f   :  { %v506_v55 = vpop.f32.mrb[0].mxu1  ;;  %v786_v56 = vpop.f32.mrb[0].mxu0 }
 0x120   :  { %v809_v57 = vadd.f32 %v808_v54, %v506_v55  ;;  %v508_v58 = vpop.f32.mrb[1].mxu1  ;;  %v788_v59 = vpop.f32.mrb[1].mxu0 }
 0x122   :  { %v810_v60 = vadd.f32 %v809_v57, %v786_v56 }
 0x124   :  { %791 = vst.msk [vmem:[#allocation7] sm:$0x3] %vm790_vm0, %v810_v60 }
 0x125   :  { %890 = shalt.err (!%p887_p6)
}
 0x126   :  { %s891_s13 = scalar_lea.hbm %s991_s3, 32 }
 0x127   :  { %p892_p7 = scmp.ne.s32.totalorder %s991_s3, %s891_s13  ;;  %p895_p8 = scmp.lt.u32.totalorder %s891_s13, %s991_s3 }
 0x129   :  { %p897_p9 = pnand %p895_p8, %p892_p7 }
 0x12b   :  { %900 = shalt.err (!%p897_p9)
}
 0x12c   :  { %801 = dma.vmem_to_hbm [thread:$0]  %s799_s10, 32, %s991_s3, [#allocation4]  }
 0x12d   :  { %905 = dma.done.wait [#allocation4], 32  }
 0x12e   :  { %906 = vsyncadd [#allocation4], 4294967264 }
 0x12f   :  { %805 = vsyncpa [#allocation3], 1 }
 0x130   :  { %806 = vsyncpa [#allocation6], 1 }
 0x131   :  { %807 = vsyncpa [#allocation4], 1 }

</bundles_post_ra>
